<compile_context>
chip_gen: v6e
topology: v6e:2x2x1
jax: 0.10.0
libtpu: 0.0.40
codegen_flags: <defaults>
</compile_context>

<pallas_src>
import numpy as np
import jax
import jax.numpy as jnp
from jax import lax
from jax.experimental import pallas as pl
from jax.experimental.pallas import tpu as pltpu

BN_EPS = 1e-5


def _round_up(x, m):
    return ((x + m - 1) // m) * m


def _epilogue(y, consts, o_ref):
    """bias add -> SiLU -> folded eval-mode BN, then store."""
    y = y + consts[0:1, :]                              # conv bias
    y = y * jax.nn.sigmoid(y)                           # SiLU (EUP sigmoid)
    o_ref[...] = y * consts[1:2, :] + consts[2:3, :]    # folded BN


# ---------------------------------------------------------------------------
# Kernel A: whole K fits in one block (small Cin / 1x1 conv).
#   (tile_m, K) @ (K, CoutG) -> epilogue
# ---------------------------------------------------------------------------
def convblock_kernel(x_ref, w_ref, const_ref, o_ref):
    y = jnp.dot(x_ref[...], w_ref[...], preferred_element_type=jnp.float32)
    _epilogue(y, const_ref[...], o_ref)


# ---------------------------------------------------------------------------
# Kernel B: K-tiled reduction with a VMEM f32 accumulator (large Cin / 3x3).
#   grid = (groups, m_tiles, k_tiles)  -- k axis is "arbitrary"
# ---------------------------------------------------------------------------
def convblock_kernel_ktiled(x_ref, w_ref, const_ref, o_ref, acc_ref):
    k = pl.program_id(2)

    @pl.when(k == 0)
    def _():
        acc_ref[...] = jnp.zeros_like(acc_ref)

    acc_ref[...] += jnp.dot(x_ref[...], w_ref[...],
                            preferred_element_type=jnp.float32)

    @pl.when(k == pl.num_programs(2) - 1)
    def _():
        _epilogue(acc_ref[...], const_ref[...], o_ref)


def conv_block_forward(x, conv_w, conv_b, bn_g, bn_b, bn_rm, bn_rv,
                       *, kernel_size, padding, groups,
                       tile_rows=256, tile_k=512, max_k_no_tile=1536,
                       use_bf16_matmul=False):
    """ConvBlock.forward: bn(SiLU(conv2d(x))) with eval-mode BatchNorm.

    x:      (B, Cin, H, W)  NCHW (PyTorch layout)
    conv_w: (Cout, Cin // groups, kh, kw)   conv_b / bn_*: (Cout,)
    returns (B, Cout, Hout, Wout) float32
    """
    B, Cin, H, W = x.shape
    Cout = conv_w.shape[0]
    kh = kw = kernel_size
    assert Cin % groups == 0 and Cout % groups == 0
    cing, coutg = Cin // groups, Cout // groups
    Hout = H + 2 * padding - kh + 1
    Wout = W + 2 * padding - kw + 1
    n_rows = B * Hout * Wout
    Kg = kh * kw * cing

    # ---- fold eval-mode BatchNorm once, outside the kernel -------------------
    scale = bn_g * lax.rsqrt(bn_rv + BN_EPS)
    shift = bn_b - bn_rm * scale
    consts = jnp.stack([conv_b, scale, shift], axis=0)              # (3, Cout)
    consts = consts.reshape(3, groups, coutg).transpose(1, 0, 2)    # (G, 3, CoutG)

    # ---- im2col (channels-last); layout plumbing stays in the wrapper --------
    xp = jnp.transpose(x, (0, 2, 3, 1))                             # NHWC
    if padding:
        xp = jnp.pad(xp, ((0, 0), (padding, padding), (padding, padding), (0, 0)))
    taps = []
    for ih in range(kh):
        for iw in range(kw):
            taps.append(xp[:, ih:ih + Hout, iw:iw + Wout, :])
    patches = jnp.concatenate(taps, axis=-1)                        # (B,Ho,Wo,kh*kw*Cin)
    patches = patches.reshape(B, Hout, Wout, kh * kw, groups, cing)
    patches = patches.transpose(4, 0, 1, 2, 3, 5).reshape(groups, n_rows, Kg)

    # ---- weight: (Cout, cing, kh, kw) -> (G, Kg, CoutG), matching patch order -
    w = conv_w.reshape(groups, coutg, cing, kh, kw)
    w = w.transpose(0, 3, 4, 2, 1).reshape(groups, Kg, coutg)

    if use_bf16_matmul:   # production-size option (v6e/v7x); f32 accumulation kept
        patches = patches.astype(jnp.bfloat16)
        w = w.astype(jnp.bfloat16)

    # ---- K tiling: only when the reduction dim is large ----------------------
    if Kg > max_k_no_tile:
        tk = tile_k                                  # multiple of 128 (lane ok)
        Kg_pad = _round_up(Kg, tk)
        num_k = Kg_pad // tk
    else:
        tk = Kg                                      # full-dim block, no tiling
        Kg_pad = Kg
        num_k = 1
    if Kg_pad != Kg:
        patches = jnp.pad(patches, ((0, 0), (0, 0), (0, Kg_pad - Kg)))
        w = jnp.pad(w, ((0, 0), (0, Kg_pad - Kg), (0, 0)))

    # ---- row tiling: large MXU tiles, cdiv grid + zero-padded tail -----------
    tile_m = min(tile_rows, _round_up(n_rows, 8))
    num_m = pl.cdiv(n_rows, tile_m)
    n_pad = num_m * tile_m
    if n_pad != n_rows:
        patches = jnp.pad(patches, ((0, 0), (0, n_pad - n_rows), (0, 0)))

    out_shape = jax.ShapeDtypeStruct((groups, n_pad, coutg), jnp.float32)

    if num_k == 1:
        out = pl.pallas_call(
            convblock_kernel,
            out_shape=out_shape,
            grid=(groups, num_m),
            in_specs=[
                pl.BlockSpec((None, tile_m, tk), lambda g, i: (g, i, 0)),
                pl.BlockSpec((None, tk, coutg), lambda g, i: (g, 0, 0)),
                pl.BlockSpec((None, 3, coutg), lambda g, i: (g, 0, 0)),
            ],
            out_specs=pl.BlockSpec((None, tile_m, coutg), lambda g, i: (g, i, 0)),
            compiler_params=pltpu.CompilerParams(
                dimension_semantics=("parallel", "parallel")),
        )(patches, w, consts)
    else:
        out = pl.pallas_call(
            convblock_kernel_ktiled,
            out_shape=out_shape,
            grid=(groups, num_m, num_k),
            in_specs=[
                pl.BlockSpec((None, tile_m, tk), lambda g, i, k: (g, i, k)),
                pl.BlockSpec((None, tk, coutg), lambda g, i, k: (g, k, 0)),
                pl.BlockSpec((None, 3, coutg), lambda g, i, k: (g, 0, 0)),
            ],
            out_specs=pl.BlockSpec((None, tile_m, coutg),
                                   lambda g, i, k: (g, i, 0)),
            scratch_shapes=[pltpu.VMEM((tile_m, coutg), jnp.float32)],
            compiler_params=pltpu.CompilerParams(
                dimension_semantics=("parallel", "parallel", "arbitrary")),
        )(patches, w, consts)

    out = out[:, :n_rows, :]                                        # drop padded rows
    out = out.reshape(groups, B, Hout, Wout, coutg)
    out = out.transpose(1, 0, 4, 2, 3).reshape(B, Cout, Hout, Wout)  # back to NCHW
    return out


# ---------------------------------------------------------------------------
# Pure-JAX reference (same math, XLA conv) for verification
# ---------------------------------------------------------------------------
def reference_conv_block(x, conv_w, conv_b, bn_g, bn_b, bn_rm, bn_rv,
                         *, padding, groups):
    y = lax.conv_general_dilated(
        x, conv_w, window_strides=(1, 1),
        padding=[(padding, padding), (padding, padding)],
        dimension_numbers=("NCHW", "OIHW", "NCHW"),
        feature_group_count=groups,
        precision=lax.Precision.HIGHEST)
    y = y + conv_b[None, :, None, None]
    y = y * jax.nn.sigmoid(y)                                       # SiLU
    inv = 1.0 / jnp.sqrt(bn_rv + BN_EPS)
    return ((y - bn_rm[None, :, None, None]) * inv[None, :, None, None]
            * bn_g[None, :, None, None] + bn_b[None, :, None, None])


if __name__ == "__main__":
    key = jax.random.PRNGKey(0)

    def run_case(case_key, B, Cin, Cout, H, W, k, p, g):
        ks = jax.random.split(case_key, 8)
        x = jax.random.normal(ks[0], (B, Cin, H, W), jnp.float32)
        w = (jax.random.normal(ks[1], (Cout, Cin // g, k, k), jnp.float32)
             / np.sqrt(Cin // g * k * k))
        b = 0.1 * jax.random.normal(ks[2], (Cout,), jnp.float32)
        bn_g = 1.0 + 0.1 * jax.random.normal(ks[3], (Cout,), jnp.float32)
        bn_b = 0.1 * jax.random.normal(ks[4], (Cout,), jnp.float32)
        bn_rm = 0.1 * jax.random.normal(ks[5], (Cout,), jnp.float32)
        bn_rv = 0.5 + jnp.abs(0.1 * jax.random.normal(ks[6], (Cout,), jnp.float32))

        out = conv_block_forward(x, w, b, bn_g, bn_b, bn_rm, bn_rv,
                                 kernel_size=k, padding=p, groups=g)
        jax.block_until_ready(out)
        ref = reference_conv_block(x, w, b, bn_g, bn_b, bn_rm, bn_rv,
                                   padding=p, groups=g)
        np.testing.assert_allclose(np.asarray(out), np.asarray(ref),
                                   rtol=2e-3, atol=2e-3)

    k1, k2, k3 = jax.random.split(key, 3)
    # captioner-style 1x1 projection ConvBlock (stand-in sizes for 2048 -> im_dim)
    run_case(k1, B=2, Cin=64, Cout=128, H=8, W=8, k=1, p=0, g=1)
    # general ConvBlock: 3x3 kernel, padding=1, grouped conv
    run_case(k2, B=2, Cin=16, Cout=32, H=16, W=16, k=3, p=1, g=2)
    # large reduction dim -> exercises the K-tiled accumulator kernel
    run_case(k3, B=1, Cin=192, Cout=64, H=8, W=8, k=3, p=1, g=1)

    print("KERNEL_OK")
</pallas_src>

<mosaic_0001>
module attributes {stable_mosaic.version = 11 : i64} {
  func.func @convblock_kernel(%arg0: i32, %arg1: i32, %arg2: memref<1x128x64xf32, #tpu.memory_space<vmem>>, %arg3: memref<1x64x128xf32, #tpu.memory_space<vmem>>, %arg4: memref<1x3x128xf32, #tpu.memory_space<vmem>>, %arg5: memref<1x128x128xf32, #tpu.memory_space<vmem>>) attributes {dimension_semantics = [#tpu.dimension_semantics<parallel>, #tpu.dimension_semantics<parallel>], iteration_bounds = array<i64: 1, 1>, scalar_prefetch = 0 : i64, scratch_operands = 0 : i64, tpu.core_type = #tpu.core_type<tc>, window_params = [{transform_indices = @transform_0, window_bounds = array<i64: 1, 128, 64>}, {transform_indices = @transform_1, window_bounds = array<i64: 1, 64, 128>}, {transform_indices = @transform_2, window_bounds = array<i64: 1, 3, 128>}, {transform_indices = @transform_3, window_bounds = array<i64: 1, 128, 128>}]} {
    %c0 = arith.constant 0 : index
    %c0_0 = arith.constant 0 : index
    %c0_1 = arith.constant 0 : index
    %0 = vector.load %arg2[%c0, %c0_0, %c0_1] : memref<1x128x64xf32, #tpu.memory_space<vmem>>, vector<1x128x64xf32>
    %1 = vector.shape_cast %0 : vector<1x128x64xf32> to vector<128x64xf32>
    %c0_2 = arith.constant 0 : index
    %c0_3 = arith.constant 0 : index
    %c0_4 = arith.constant 0 : index
    %2 = vector.load %arg3[%c0_2, %c0_3, %c0_4] : memref<1x64x128xf32, #tpu.memory_space<vmem>>, vector<1x64x128xf32>
    %3 = vector.shape_cast %2 : vector<1x64x128xf32> to vector<64x128xf32>
    %cst = arith.constant dense<0.000000e+00> : vector<128x128xf32>
    %4 = tpu.matmul %1, %3, %cst {dimension_numbers = #tpu.dot_dimension_numbers<[1], [0], [0], [1], [0, 0, 1, 1], [], []>} : vector<128x64xf32>, vector<64x128xf32>, vector<128x128xf32> -> vector<128x128xf32>
    %c0_5 = arith.constant 0 : index
    %c0_6 = arith.constant 0 : index
    %c0_7 = arith.constant 0 : index
    %5 = vector.load %arg4[%c0_5, %c0_6, %c0_7] : memref<1x3x128xf32, #tpu.memory_space<vmem>>, vector<1x3x128xf32>
    %6 = vector.shape_cast %5 : vector<1x3x128xf32> to vector<3x128xf32>
    %7 = vector.extract_strided_slice %6 {offsets = [0, 0], sizes = [1, 128], strides = [1, 1]} : vector<3x128xf32> to vector<1x128xf32>
    %8 = vector.broadcast %7 : vector<1x128xf32> to vector<128x128xf32>
    %9 = arith.addf %4, %8 : vector<128x128xf32>
    %10 = arith.negf %9 : vector<128x128xf32>
    %11 = math.exp %10 : vector<128x128xf32>
    %cst_8 = arith.constant 1.000000e+00 : f32
    %12 = vector.broadcast %cst_8 : f32 to vector<128x128xf32>
    %13 = arith.addf %12, %11 : vector<128x128xf32>
    %14 = arith.divf %12, %13 : vector<128x128xf32>
    %15 = arith.mulf %9, %14 : vector<128x128xf32>
    %16 = vector.extract_strided_slice %6 {offsets = [1, 0], sizes = [1, 128], strides = [1, 1]} : vector<3x128xf32> to vector<1x128xf32>
    %17 = vector.broadcast %16 : vector<1x128xf32> to vector<128x128xf32>
    %18 = arith.mulf %15, %17 : vector<128x128xf32>
    %19 = vector.extract_strided_slice %6 {offsets = [2, 0], sizes = [1, 128], strides = [1, 1]} : vector<3x128xf32> to vector<1x128xf32>
    %20 = vector.broadcast %19 : vector<1x128xf32> to vector<128x128xf32>
    %21 = arith.addf %18, %20 : vector<128x128xf32>
    %c0_9 = arith.constant 0 : index
    %c0_10 = arith.constant 0 : index
    %c0_11 = arith.constant 0 : index
    %22 = vector.load %arg5[%c0_9, %c0_10, %c0_11] : memref<1x128x128xf32, #tpu.memory_space<vmem>>, vector<1x128x128xf32>
    %23 = vector.shape_cast %22 : vector<1x128x128xf32> to vector<128x128xf32>
    %24 = vector.shape_cast %21 : vector<128x128xf32> to vector<1x128x128xf32>
    tpu.vector_store %arg5[%c0_9, %c0_10, %c0_11], %24 {strides = array<i32>} : memref<1x128x128xf32, #tpu.memory_space<vmem>>, vector<1x128x128xf32>,
    return
  }
  func.func @transform_0(%arg0: i32, %arg1: i32) -> (i32, i32, i32) {
    %c0_i32 = arith.constant 0 : i32
    %c0_i32_0 = arith.constant 0 : i32
    return %arg0, %arg1, %c0_i32 : i32, i32, i32
  }
  func.func @transform_1(%arg0: i32, %arg1: i32) -> (i32, i32, i32) {
    %c0_i32 = arith.constant 0 : i32
    %c0_i32_0 = arith.constant 0 : i32
    %c0_i32_1 = arith.constant 0 : i32
    return %arg0, %c0_i32, %c0_i32_0 : i32, i32, i32
  }
  func.func @transform_2(%arg0: i32, %arg1: i32) -> (i32, i32, i32) {
    %c0_i32 = arith.constant 0 : i32
    %c0_i32_0 = arith.constant 0 : i32
    %c0_i32_1 = arith.constant 0 : i32
    return %arg0, %c0_i32, %c0_i32_0 : i32, i32, i32
  }
  func.func @transform_3(%arg0: i32, %arg1: i32) -> (i32, i32, i32) {
    %c0_i32 = arith.constant 0 : i32
    %c0_i32_0 = arith.constant 0 : i32
    return %arg0, %arg1, %c0_i32 : i32, i32, i32
  }
}

</mosaic_0001>

<bundles_post_ra>
// kernel: tpu_custom_call.1
= control target key start
LH: loop header
LB: loop body
LE: loop exit
PB: predicated region body
PF: predicated region fallthrough
CT: control target
= control target key end

     0   :  { %s850_s0 = inlined_call_operand.vmem [shape: f32[1,128,64], index: 0, kind: input, shape index: {}]   ;;  %s851_s1 = inlined_call_operand.vmem [shape: f32[1,64,128], index: 1, kind: input, shape index: {}]   ;;  %s852_s2 = inlined_call_operand.vmem [shape: f32[1,3,128], index: 2, kind: input, shape index: {}]   ;;  %s853_s3 = inlined_call_operand.hbm [shape: f32[1,128,128], index: 3, kind: output, shape index: {}]  }
   0x1   :  { %v38_v0 = vld [vmem:[%s851_s1 + $0x38] sm:$0xff]  ;;  %v37_v1 = vld [vmem:[%s851_s1 + $0x30] sm:$0xff]  ;;  %v36_v2 = vld [vmem:[%s851_s1 + $0x28] sm:$0xff] }
   0x2   :  { %478 = vmatprep.subr.mxu0 %v38_v0  ;;  %518 = vmatprep.subr.mxu1 %v38_v0  ;;  %v35_v3 = vld [vmem:[%s851_s1 + $0x20] sm:$0xff]  ;;  %v34_v4 = vld [vmem:[%s851_s1 + $0x18] sm:$0xff]  ;;  %v33_v5 = vld [vmem:[%s851_s1 + $0x10] sm:$0xff] }
   0x3   :  { %479 = vmatpush3.msra.mxu0 %v38_v0  ;;  %526 = vmatpush3.msra.mxu1 %v38_v0 }
   0x4   :  { %480 = vmatprep.subr.mxu0 %v37_v1  ;;  %519 = vmatprep.subr.mxu1 %v37_v1 }
   0x5   :  { %481 = vmatpush3.msra.mxu0 %v37_v1  ;;  %527 = vmatpush3.msra.mxu1 %v37_v1 }
   0x6   :  { %482 = vmatprep.subr.mxu0 %v36_v2  ;;  %520 = vmatprep.subr.mxu1 %v36_v2 }
   0x7   :  { %483 = vmatpush3.msra.mxu0 %v36_v2  ;;  %528 = vmatpush3.msra.mxu1 %v36_v2 }
   0x8   :  { %484 = vmatprep.subr.mxu0 %v35_v3  ;;  %521 = vmatprep.subr.mxu1 %v35_v3 }
   0x9   :  { %485 = vmatpush3.msra.mxu0 %v35_v3  ;;  %529 = vmatpush3.msra.mxu1 %v35_v3 }
   0xa   :  { %8 = vsyncpa [#allocation3], 0  ;;  %486 = vmatprep.subr.mxu0 %v34_v4  ;;  %522 = vmatprep.subr.mxu1 %v34_v4  ;;  %v32_v6 = vld [vmem:[%s851_s1 + $0x8] sm:$0xff]  ;;  %v31_v7 = vld [vmem:[%s851_s1] sm:$0xff]  ;;  %vm44_vm0 = vcmask 523264   ;;  %v40_v24 = vlaneseq }
   0xb   :  { %487 = vmatpush3.msra.mxu0 %v34_v4  ;;  %530 = vmatpush3.msra.mxu1 %v34_v4  ;;  %v15_v8 = vld [vmem:[%s850_s0] sm:$0xff]  ;;  %v16_v10 = vld [vmem:[%s850_s0 + $0x8] sm:$0xff]  ;;  %v17_v12 = vld [vmem:[%s850_s0 + $0x10] sm:$0xff] }
   0xc   :  { %488 = vmatprep.subr.mxu0 %v33_v5  ;;  %523 = vmatprep.subr.mxu1 %v33_v5  ;;  %v23_v9 = vld [vmem:[%s850_s0 + $0x40] sm:$0xff]  ;;  %v24_v11 = vld [vmem:[%s850_s0 + $0x48] sm:$0xff]  ;;  %v25_v13 = vld [vmem:[%s850_s0 + $0x50] sm:$0xff]  ;;  %v734_v25 = vshrl.u32 %v40_v24, 7 }
   0xd   :  { %489 = vmatpush3.msra.mxu0 %v33_v5  ;;  %531 = vmatpush3.msra.mxu1 %v33_v5  ;;  %v18_v14 = vld [vmem:[%s850_s0 + $0x18] sm:$0xff]  ;;  %v19_v16 = vld [vmem:[%s850_s0 + $0x20] sm:$0xff]  ;;  %v20_v18 = vld [vmem:[%s850_s0 + $0x28] sm:$0xff] }
   0xe   :  { %490 = vmatprep.subr.mxu0 %v32_v6  ;;  %524 = vmatprep.subr.mxu1 %v32_v6  ;;  %v26_v15 = vld [vmem:[%s850_s0 + $0x58] sm:$0xff]  ;;  %v27_v17 = vld [vmem:[%s850_s0 + $0x60] sm:$0xff]  ;;  %v28_v19 = vld [vmem:[%s850_s0 + $0x68] sm:$0xff]  ;;  %v42_v26 = vsub.s32 0, %v734_v25 }
   0xf   :  { %491 = vmatpush3.msra.mxu0 %v32_v6  ;;  %532 = vmatpush3.msra.mxu1 %v32_v6  ;;  %v21_v20 = vld [vmem:[%s850_s0 + $0x30] sm:$0xff]  ;;  %v22_v22 = vld [vmem:[%s850_s0 + $0x38] sm:$0xff]  ;;  %v740_v27 = vld [vmem:[%s852_s2] sm:$0x7] }
  0x10   :  { %492 = vmatprep.subr.mxu0 %v31_v7  ;;  %525 = vmatprep.subr.mxu1 %v31_v7  ;;  %v29_v21 = vld [vmem:[%s850_s0 + $0x70] sm:$0xff]  ;;  %v30_v23 = vld [vmem:[%s850_s0 + $0x78] sm:$0xff]  ;;  %v43_v28 = vrot.slane %v740_v27, %v42_v26  ;;  %s623_s0 = smov [#allocation2]  }
  0x11   :  { %493 = vmatpush3.msra.mxu0 %v31_v7  ;;  %533 = vmatpush3.msra.mxu1 %v31_v7  ;;  %s411_s2 = sshll.u32 %s623_s0, 4  ;;  %s412_s2 = int_to_ptr.vmem [resolvable:$true] %s411_s2 }
  0x12   :  { %494 = vmatprep.mubr.msk.f32.mxu0 %vm44_vm0, %v15_v8  ;;  %506 = vmatprep.mubr.msk.f32.mxu1 %vm44_vm0, %v23_v9  ;;  %s601_s1 = scalar_lea.vmem %s412_s2, 2048  ;;  %p606_p1 = scmp.lt.s32.totalorder %s412_s2, %s412_s2 }
  0x13   :  { %495 = vmatmul.mubr.msk.f32.vlgmr.msra.gmra.mxu0 %vm44_vm0, %v16_v10  ;;  %507 = vmatmul.mubr.msk.f32.vlgmr.msra.gmra.mxu1 %vm44_vm0, %v24_v11  ;;  %p602_p0 = scmp.ne.s32.totalorder %s412_s2, %s601_s1  ;;  %p607_p2 = scmp.lt.s32.totalorder %s601_s1, %s601_s1 }
  0x14   :  { %497 = vmatprep.mubr.msk.f32.mxu0 %vm44_vm0, %v17_v12  ;;  %509 = vmatprep.mubr.msk.f32.mxu1 %vm44_vm0, %v25_v13 }
  0x15   :  { %p608_p3 = por %p607_p2, %p606_p1 }
  0x17   :  { %498 = vmatmul.mubr.msk.f32.gmra.mxu0 %vm44_vm0, %v18_v14  ;;  %510 = vmatmul.mubr.msk.f32.gmra.mxu1 %vm44_vm0, %v26_v15  ;;  %p609_p4 = pnand %p608_p3, %p602_p0 }
  0x18   :  { %500 = vmatprep.mubr.msk.f32.mxu0 %vm44_vm0, %v19_v16  ;;  %512 = vmatprep.mubr.msk.f32.mxu1 %vm44_vm0, %v27_v17 }
  0x1b   :  { %501 = vmatmul.mubr.msk.f32.gmra.mxu0 %vm44_vm0, %v20_v18  ;;  %513 = vmatmul.mubr.msk.f32.gmra.mxu1 %vm44_vm0, %v28_v19 }
  0x1c   :  { %503 = vmatprep.mubr.msk.f32.mxu0 %vm44_vm0, %v21_v20  ;;  %515 = vmatprep.mubr.msk.f32.mxu1 %vm44_vm0, %v29_v21 }
  0x1f   :  { %504 = vmatmul.mubr.msk.f32.gmra.mxu0 %vm44_vm0, %v22_v22  ;;  %516 = vmatmul.mubr.msk.f32.gmra.mxu1 %vm44_vm0, %v30_v23 }
  0xd3   :  { %v496_v29 = vpop.f32.mrf.mxu0  ;;  %v508_v30 = vpop.f32.mrf.mxu1 }
  0xd4   :  { %v743_v31 = vadd.f32 %v496_v29, %v43_v28  ;;  %v745_v32 = vadd.f32 %v508_v30, %v43_v28 }
  0xd5   :  { %v159_v33 = vpop.f32.mrf.mxu0  ;;  %v199_v34 = vpop.f32.mrf.mxu1 }
  0xd6   :  { %v439_v35 = vmul.f32 -1.442695, %v743_v31  ;;  %v447_v36 = vmul.f32 -1.442695, %v745_v32  ;;  %v749_v37 = vadd.f32 %v159_v33, %v43_v28  ;;  %v751_v38 = vadd.f32 %v199_v34, %v43_v28 }
  0xd7   :  { %v499_v39 = vpop.f32.mrf.mxu0  ;;  %v511_v40 = vpop.f32.mrf.mxu1 }
  0xd8   :  { %537 = vpow2.f32 %v439_v35  ;;  %v438_v41 = vmul.f32 -1.442695, %v749_v37  ;;  %v446_v42 = vmul.f32 -1.442695, %v751_v38  ;;  %v755_v43 = vadd.f32 %v499_v39, %v43_v28 }
  0xd9   :  { %539 = vpow2.f32 %v447_v36  ;;  %v757_v44 = vadd.f32 %v511_v40, %v43_v28  ;;  %v169_v45 = vpop.f32.mrf.mxu0  ;;  %v209_v46 = vpop.f32.mrf.mxu1 }
  0xda   :  { %541 = vpow2.f32 %v438_v41  ;;  %v441_v47 = vmul.f32 -1.442695, %v755_v43  ;;  %v760_v48 = vadd.f32 %v169_v45, %v43_v28  ;;  %v762_v49 = vadd.f32 %v209_v46, %v43_v28 }
  0xdb   :  { %543 = vpow2.f32 %v446_v42  ;;  %v449_v50 = vmul.f32 -1.442695, %v757_v44  ;;  %v502_v51 = vpop.f32.mrf.mxu0  ;;  %v514_v52 = vpop.f32.mrf.mxu1  ;;  %v352_v41 = vsub.s32 1, %v734_v25 }
  0xdc   :  { %545 = vpow2.f32 %v441_v47  ;;  %v440_v53 = vmul.f32 -1.442695, %v760_v48  ;;  %v448_v54 = vmul.f32 -1.442695, %v762_v49  ;;  %v767_v55 = vadd.f32 %v502_v51, %v43_v28 }
  0xdd   :  { %547 = vpow2.f32 %v449_v50  ;;  %v769_v56 = vadd.f32 %v514_v52, %v43_v28  ;;  %v179_v57 = vpop.f32.mrf.mxu0  ;;  %v219_v58 = vpop.f32.mrf.mxu1  ;;  %v372_v50 = vsub.s32 2, %v734_v25 }
  0xde   :  { %549 = vpow2.f32 %v440_v53  ;;  %v443_v59 = vmul.f32 -1.442695, %v767_v55  ;;  %v772_v60 = vadd.f32 %v179_v57, %v43_v28  ;;  %v774_v61 = vadd.f32 %v219_v58, %v43_v28 }
  0xdf   :  { %551 = vpow2.f32 %v448_v54  ;;  %v451_v62 = vmul.f32 -1.442695, %v769_v56  ;;  %v505_v63 = vpop.f32.mrf.mxu0  ;;  %v517_v0 = vpop.f32.mrf.mxu1  ;;  %v794_v57 = vrot.slane %v740_v27, %v352_v41 }
  0xe0   :  { %553 = vpow2.f32 %v443_v59  ;;  %v442_v1 = vmul.f32 -1.442695, %v772_v60  ;;  %v450_v2 = vmul.f32 -1.442695, %v774_v61  ;;  %v779_v3 = vadd.f32 %v505_v63, %v43_v28 }
  0xe1   :  { %555 = vpow2.f32 %v451_v62  ;;  %v781_v4 = vadd.f32 %v517_v0, %v43_v28  ;;  %v189_v5 = vpop.f32.mrf.mxu0  ;;  %v229_v6 = vpop.f32.mrf.mxu1 }
  0xe2   :  { %557 = vpow2.f32 %v442_v1  ;;  %v445_v7 = vmul.f32 -1.442695, %v779_v3  ;;  %v784_v8 = vadd.f32 %v189_v5, %v43_v28  ;;  %v786_v9 = vadd.f32 %v229_v6, %v43_v28 }
  0xe3   :  { %559 = vpow2.f32 %v450_v2  ;;  %v453_v10 = vmul.f32 -1.442695, %v781_v4  ;;  %v798_v1 = vrot.slane %v740_v27, %v372_v50 }
  0xe4   :  { %561 = vpow2.f32 %v445_v7  ;;  %v444_v11 = vmul.f32 -1.442695, %v784_v8  ;;  %v452_v12 = vmul.f32 -1.442695, %v786_v9 }
  0xe5   :  { %v538_v13 = vpop.eup %537  ;;  %563 = vpow2.f32 %v453_v10 }
  0xe6   :  { %v540_v14 = vpop.eup %539  ;;  %v287_v15 = vadd.f32 1.0, %v538_v13  ;;  %565 = vpow2.f32 %v444_v11 }
  0xe7   :  { %v542_v16 = vpop.eup %541  ;;  %v295_v17 = vadd.f32 1.0, %v540_v14  ;;  %567 = vpow2.f32 %v452_v12 }
  0xe8   :  { %v544_v18 = vpop.eup %543  ;;  %569 = vrcp.f32 %v287_v15  ;;  %v286_v19 = vadd.f32 1.0, %v542_v16 }
  0xe9   :  { %v546_v20 = vpop.eup %545  ;;  %571 = vrcp.f32 %v295_v17  ;;  %v294_v21 = vadd.f32 1.0, %v544_v18 }
  0xea   :  { %v548_v22 = vpop.eup %547  ;;  %573 = vrcp.f32 %v286_v19  ;;  %v289_v23 = vadd.f32 1.0, %v546_v20 }
  0xeb   :  { %v550_v24 = vpop.eup %549  ;;  %575 = vrcp.f32 %v294_v21  ;;  %v297_v26 = vadd.f32 1.0, %v548_v22 }
  0xec   :  { %v552_v28 = vpop.eup %551  ;;  %577 = vrcp.f32 %v289_v23  ;;  %v288_v29 = vadd.f32 1.0, %v550_v24 }
  0xed   :  { %v554_v30 = vpop.eup %553  ;;  %579 = vrcp.f32 %v297_v26  ;;  %v296_v33 = vadd.f32 1.0, %v552_v28 }
  0xee   :  { %v556_v34 = vpop.eup %555  ;;  %581 = vrcp.f32 %v288_v29  ;;  %v291_v35 = vadd.f32 1.0, %v554_v30 }
  0xef   :  { %v558_v36 = vpop.eup %557  ;;  %583 = vrcp.f32 %v296_v33  ;;  %v299_v39 = vadd.f32 1.0, %v556_v34 }
  0xf0   :  { %v560_v40 = vpop.eup %559  ;;  %585 = vrcp.f32 %v291_v35  ;;  %v290_v42 = vadd.f32 1.0, %v558_v36 }
  0xf1   :  { %v562_v45 = vpop.eup %561  ;;  %587 = vrcp.f32 %v299_v39  ;;  %v298_v46 = vadd.f32 1.0, %v560_v40 }
  0xf2   :  { %v564_v47 = vpop.eup %563  ;;  %589 = vrcp.f32 %v290_v42  ;;  %v293_v51 = vadd.f32 1.0, %v562_v45 }
  0xf3   :  { %v566_v52 = vpop.eup %565  ;;  %591 = vrcp.f32 %v298_v46  ;;  %v301_v53 = vadd.f32 1.0, %v564_v47 }
  0xf4   :  { %v568_v54 = vpop.eup %567  ;;  %593 = vrcp.f32 %v293_v51  ;;  %v292_v58 = vadd.f32 1.0, %v566_v52 }
  0xf5   :  { %v570_v59 = vpop.eup %569  ;;  %595 = vrcp.f32 %v301_v53  ;;  %v300_v62 = vadd.f32 1.0, %v568_v54 }
  0xf6   :  { %v572_v63 = vpop.eup %571  ;;  %v335_v0 = vmul.f32 %v570_v59, %v743_v31  ;;  %597 = vrcp.f32 %v292_v58 }
  0xf7   :  { %v574_v25 = vpop.eup %573  ;;  %v343_v2 = vmul.f32 %v572_v63, %v745_v32  ;;  %599 = vrcp.f32 %v300_v62 }
  0xf8   :  { %v576_v5 = vpop.eup %575  ;;  %v355_v6 = vmul.f32 %v794_v57, %v335_v0  ;;  %v334_v7 = vmul.f32 %v574_v25, %v749_v37 }
  0xf9   :  { %v578_v10 = vpop.eup %577  ;;  %v363_v11 = vmul.f32 %v794_v57, %v343_v2  ;;  %v342_v12 = vmul.f32 %v576_v5, %v751_v38 }
  0xfa   :  { %v580_v13 = vpop.eup %579  ;;  %v375_v31 = vadd.f32 %v798_v1, %v355_v6  ;;  %v354_v27 = vmul.f32 %v794_v57, %v334_v7  ;;  %v337_v14 = vmul.f32 %v578_v10, %v755_v43 }
  0xfb   :  { %v582_v15 = vpop.eup %581  ;;  %v383_v32 = vadd.f32 %v798_v1, %v363_v11  ;;  %v362_v16 = vmul.f32 %v794_v57, %v342_v12  ;;  %v345_v17 = vmul.f32 %v580_v13, %v757_v44 }
  0xfc   :  { %v584_v37 = vpop.eup %583  ;;  %391 = vst [vmem:[#allocation2 + $0x8] sm:$0xff] %v375_v31  ;;  %v374_v18 = vadd.f32 %v798_v1, %v354_v27  ;;  %v357_v38 = vmul.f32 %v794_v57, %v337_v14  ;;  %v336_v19 = vmul.f32 %v582_v15, %v760_v48 }
  0xfd   :  { %v586_v20 = vpop.eup %585  ;;  %399 = vst [vmem:[#allocation2 + $0x48] sm:$0xff] %v383_v32  ;;  %v382_v21 = vadd.f32 %v798_v1, %v362_v16  ;;  %v365_v43 = vmul.f32 %v794_v57, %v345_v17  ;;  %v344_v22 = vmul.f32 %v584_v37, %v762_v49 }
  0xfe   :  { %v588_v23 = vpop.eup %587  ;;  %390 = vst [vmem:[#allocation2] sm:$0xff] %v374_v18  ;;  %v377_v44 = vadd.f32 %v798_v1, %v357_v38  ;;  %v356_v24 = vmul.f32 %v794_v57, %v336_v19  ;;  %v339_v26 = vmul.f32 %v586_v20, %v767_v55 }
  0xff   :  { %v590_v28 = vpop.eup %589  ;;  %398 = vst [vmem:[#allocation2 + $0x40] sm:$0xff] %v382_v21  ;;  %v385_v48 = vadd.f32 %v798_v1, %v365_v43  ;;  %v364_v29 = vmul.f32 %v794_v57, %v344_v22  ;;  %v347_v30 = vmul.f32 %v588_v23, %v769_v56 }
 0x100   :  { %v592_v33 = vpop.eup %591  ;;  %393 = vst [vmem:[#allocation2 + $0x18] sm:$0xff] %v377_v44  ;;  %v376_v49 = vadd.f32 %v798_v1, %v356_v24  ;;  %v359_v34 = vmul.f32 %v794_v57, %v339_v26  ;;  %v338_v35 = vmul.f32 %v590_v28, %v772_v60 }
 0x101   :  { %v594_v36 = vpop.eup %593  ;;  %401 = vst [vmem:[#allocation2 + $0x58] sm:$0xff] %v385_v48  ;;  %v384_v55 = vadd.f32 %v798_v1, %v364_v29  ;;  %v367_v39 = vmul.f32 %v794_v57, %v347_v30  ;;  %v346_v40 = vmul.f32 %v592_v33, %v774_v61 }
 0x102   :  { %v596_v41 = vpop.eup %595  ;;  %392 = vst [vmem:[#allocation2 + $0x10] sm:$0xff] %v376_v49  ;;  %v379_v56 = vadd.f32 %v798_v1, %v359_v34  ;;  %v358_v42 = vmul.f32 %v794_v57, %v338_v35  ;;  %v341_v45 = vmul.f32 %v594_v36, %v779_v3 }
 0x103   :  { %v598_v46 = vpop.eup %597  ;;  %400 = vst [vmem:[#allocation2 + $0x50] sm:$0xff] %v384_v55  ;;  %v387_v60 = vadd.f32 %v798_v1, %v367_v39  ;;  %v366_v47 = vmul.f32 %v794_v57, %v346_v40  ;;  %v349_v50 = vmul.f32 %v596_v41, %v781_v4 }
 0x104   :  { %v600_v51 = vpop.eup %599  ;;  %395 = vst [vmem:[#allocation2 + $0x28] sm:$0xff] %v379_v56  ;;  %v378_v61 = vadd.f32 %v798_v1, %v358_v42  ;;  %v361_v52 = vmul.f32 %v794_v57, %v341_v45  ;;  %v340_v53 = vmul.f32 %v598_v46, %v784_v8 }
 0x105   :  { %403 = vst [vmem:[#allocation2 + $0x68] sm:$0xff] %v387_v60  ;;  %v386_v54 = vadd.f32 %v798_v1, %v366_v47  ;;  %v369_v3 = vmul.f32 %v794_v57, %v349_v50  ;;  %v348_v58 = vmul.f32 %v600_v51, %v786_v9 }
 0x106   :  { %394 = vst [vmem:[#allocation2 + $0x20] sm:$0xff] %v378_v61  ;;  %v381_v4 = vadd.f32 %v798_v1, %v361_v52  ;;  %v360_v59 = vmul.f32 %v794_v57, %v340_v53 }
 0x107   :  { %402 = vst [vmem:[#allocation2 + $0x60] sm:$0xff] %v386_v54  ;;  %v389_v62 = vadd.f32 %v798_v1, %v369_v3  ;;  %v368_v63 = vmul.f32 %v794_v57, %v348_v58 }
 0x108   :  { %397 = vst [vmem:[#allocation2 + $0x38] sm:$0xff] %v381_v4  ;;  %v380_v8 = vadd.f32 %v798_v1, %v360_v59 }
 0x109   :  { %405 = vst [vmem:[#allocation2 + $0x78] sm:$0xff] %v389_v62  ;;  %v388_v0 = vadd.f32 %v798_v1, %v368_v63 }
 0x10a   :  { %396 = vst [vmem:[#allocation2 + $0x30] sm:$0xff] %v380_v8 }
 0x10b   :  { %404 = vst [vmem:[#allocation2 + $0x70] sm:$0xff] %v388_v0 }
 0x10c   :  { %612 = shalt.err (!%p609_p4)
}
 0x10d   :  { %s624_s7 = smov 128   ;;  %s625_s8 = smov 8  }
 0x10e   :  { %417 = dma.vmem_to_hbm [thread:$0]  %s412_s2, 2048, %s853_s3, [#allocation3], %s624_s7, %s624_s7, %s625_s8  }
 0x10f   :  { %621 = dma.done.wait [#allocation3], 2048  }
 0x110   :  { %622 = vsyncadd [#allocation3], 4294965248 }
 0x111   :  { %421 = vsyncpa [#allocation3], 1 }

</bundles_post_ra>
